<compile_context>
chip_gen: v5e
topology: v5e:2x2
jax: 0.10.0
libtpu: 0.0.40
codegen_flags: <defaults>
</compile_context>

<pallas_src>
import jax
import jax.numpy as jnp
from jax.experimental import pallas as pl
from jax.experimental.pallas import tpu as pltpu


def _round_up(x, m):
    return (x + m - 1) // m * m


def _pick_tile(total, desired, unit):
    """Largest multiple of `unit` that divides `total` and is <= desired."""
    desired = max(unit, (min(desired, total) // unit) * unit)
    for cand in range(desired, unit - 1, -unit):
        if total % cand == 0:
            return cand
    return unit


def _mlp_kernel(x_ref, w1_ref, b1_ref, w2_ref, b2_ref, o_ref, acc_ref):
    """fc1 accumulated over K tiles -> bias -> ReLU -> [dropout=id] -> fc2."""
    k = pl.program_id(1)

    @pl.when(k == 0)
    def _():
        acc_ref[...] = jnp.zeros_like(acc_ref)

    # x arrives f32 straight from HBM; cast to bf16 on the VPU (hidden under
    # DMA/MXU), accumulate in f32 on the MXU.
    acc_ref[...] += jnp.dot(x_ref[...].astype(jnp.bfloat16), w1_ref[...],
                            preferred_element_type=jnp.float32)

    @pl.when(k == pl.num_programs(1) - 1)
    def _():
        h = jnp.maximum(acc_ref[...] + b1_ref[...], 0.0)  # bias + ReLU in f32
        # TODO(synk): dropout is identity (inference). For training-mode
        # dropout, build a Bernoulli mask with pltpu.prng_seed/prng_random_bits
        # and scale by 1/(1-p).
        out = jnp.dot(h.astype(jnp.bfloat16), w2_ref[...],
                      preferred_element_type=jnp.float32)
        o_ref[...] = (out + b2_ref[...]).astype(o_ref.dtype)


def category_classifier_forward(x, w1, b1, w2, b2, *, tb=None, tk=None):
    """x: [B, V]; w1: [V, H]; b1: [H]; w2: [H, O]; b2: [O] -> [B, O]."""
    B, V = x.shape
    H = w1.shape[1]
    O = w2.shape[1]

    # Pad hidden / output / vocab to 128 lanes (lane-dense matmuls, unmasked
    # stores, exact-zero padded-K region).
    Hp = _round_up(H, 128)
    Op = _round_up(O, 128)
    Vp = _round_up(V, 128)

    # Batch tile: multiple of 16; by default a single tile for B <= 512 so w1
    # is streamed exactly once.  (On v7x prefer tb ~= round_up(B/2, 16) so the
    # "parallel" batch axis splits across both TensorCores.)
    if tb is None:
        tb = min(512, _round_up(B, 16))
    tb = max(16, _round_up(tb, 16))
    Bp = _round_up(B, tb)

    # K tile: big (long DMA bursts, few grid steps) and dividing Vp exactly.
    if tk is None:
        tk = 2048
    tk = _pick_tile(Vp, tk, 128)

    # x stays in its native dtype; only zero-pad when not already aligned.
    if Bp != B or Vp != V:
        x_p = jnp.pad(x, ((0, Bp - B), (0, Vp - V)))
    else:
        x_p = x
    # Weights/biases are small and reused: cast/pad once in the wrapper.
    w1_p = jnp.pad(w1.astype(jnp.bfloat16), ((0, Vp - V), (0, Hp - H)))
    w2_p = jnp.pad(w2.astype(jnp.bfloat16), ((0, Hp - H), (0, Op - O)))
    b1_p = jnp.pad(b1.reshape(1, H).astype(jnp.float32), ((0, 0), (0, Hp - H)))
    b2_p = jnp.pad(b2.reshape(1, O).astype(jnp.float32), ((0, 0), (0, Op - O)))

    n_b = Bp // tb
    n_k = Vp // tk
    grid = (n_b, n_k)

    itemsize_x = jnp.dtype(x_p.dtype).itemsize
    itemsize_o = jnp.dtype(x.dtype).itemsize
    cost = pl.CostEstimate(
        flops=2 * Bp * Vp * Hp + 2 * Bp * Hp * Op,
        transcendentals=0,
        bytes_accessed=(x_p.size * itemsize_x          # x streamed once (f32)
                        + n_b * w1_p.size * 2          # w1 re-read per batch tile
                        + w2_p.size * 2
                        + b1_p.size * 4 + b2_p.size * 4
                        + Bp * Op * itemsize_o),
    )

    out_padded = pl.pallas_call(
        _mlp_kernel,
        out_shape=jax.ShapeDtypeStruct((Bp, Op), x.dtype),
        grid_spec=pltpu.PrefetchScalarGridSpec(
            num_scalar_prefetch=0,
            grid=grid,
            in_specs=[
                pl.BlockSpec((tb, tk), lambda i, k: (i, k)),   # x tile (f32)
                pl.BlockSpec((tk, Hp), lambda i, k: (k, 0)),   # w1 K-tile
                pl.BlockSpec((1, Hp), lambda i, k: (0, 0)),    # b1 (resident)
                pl.BlockSpec((Hp, Op), lambda i, k: (0, 0)),   # w2 (resident)
                pl.BlockSpec((1, Op), lambda i, k: (0, 0)),    # b2 (resident)
            ],
            out_specs=pl.BlockSpec((tb, Op), lambda i, k: (i, 0)),
            scratch_shapes=[pltpu.VMEM((tb, Hp), jnp.float32)],
        ),
        compiler_params=pltpu.CompilerParams(
            dimension_semantics=("parallel", "arbitrary"),
            vmem_limit_bytes=32 * 1024 * 1024,
        ),
        cost_estimate=cost,
    )(x_p, w1_p, b1_p, w2_p, b2_p)

    return out_padded[:B, :O]


if __name__ == "__main__":
    # Small shapes consistent with the module's forward; tb=16 / tk=512 gives
    # a (2, 2) grid so both the parallel batch axis and the K-reduction
    # accumulator path are exercised even at this size (tb multiple of 16).
    batch = 32
    vocab_size = 1024
    hidden_dim = 32
    output_dim = 16

    key = jax.random.PRNGKey(0)
    kx, k1, kb1, k2, kb2 = jax.random.split(key, 5)

    x = jax.random.normal(kx, (batch, vocab_size), dtype=jnp.float32)
    bound1 = 1.0 / (vocab_size ** 0.5)
    w1 = jax.random.uniform(k1, (vocab_size, hidden_dim), jnp.float32,
                            -bound1, bound1)
    b1 = jax.random.uniform(kb1, (hidden_dim,), jnp.float32, -bound1, bound1)
    bound2 = 1.0 / (hidden_dim ** 0.5)
    w2 = jax.random.uniform(k2, (hidden_dim, output_dim), jnp.float32,
                            -bound2, bound2)
    b2 = jax.random.uniform(kb2, (output_dim,), jnp.float32, -bound2, bound2)

    out = category_classifier_forward(x, w1, b1, w2, b2, tb=16, tk=512)
    out = jax.block_until_ready(out)

    # Pure-JAX reference emulating the same bf16-operand / f32-accumulate math.
    xb = x.astype(jnp.bfloat16).astype(jnp.float32)
    w1b = w1.astype(jnp.bfloat16).astype(jnp.float32)
    w2b = w2.astype(jnp.bfloat16).astype(jnp.float32)
    h_ref = jnp.maximum(xb @ w1b + b1, 0.0)
    ref = h_ref.astype(jnp.bfloat16).astype(jnp.float32) @ w2b + b2

    assert out.shape == (batch, output_dim)
    assert out.dtype == x.dtype
    assert jnp.allclose(out, ref, atol=1e-2, rtol=1e-2), \
        float(jnp.max(jnp.abs(out - ref)))

    print("KERNEL_OK")
</pallas_src>

<mosaic_0001>
module attributes {stable_mosaic.version = 11 : i64} {
  func.func @_mlp_kernel(%arg0: i32, %arg1: i32, %arg2: memref<16x512xf32, #tpu.memory_space<vmem>>, %arg3: memref<512x128xbf16, #tpu.memory_space<vmem>>, %arg4: memref<1x128xf32, #tpu.memory_space<vmem>>, %arg5: memref<128x128xbf16, #tpu.memory_space<vmem>>, %arg6: memref<1x128xf32, #tpu.memory_space<vmem>>, %arg7: memref<16x128xf32, #tpu.memory_space<vmem>>, %arg8: memref<16x128xf32, #tpu.memory_space<vmem>>) attributes {dimension_semantics = [#tpu.dimension_semantics<parallel>, #tpu.dimension_semantics<arbitrary>], iteration_bounds = array<i64: 2, 2>, scalar_prefetch = 0 : i64, scratch_operands = 1 : i64, tpu.core_type = #tpu.core_type<tc>, window_params = [{transform_indices = @transform_0, window_bounds = array<i64: 16, 512>}, {transform_indices = @transform_1, window_bounds = array<i64: 512, 128>}, {pipeline_mode = #tpu.pipeline_mode<synchronous>, transform_indices = @transform_2, window_bounds = array<i64: 1, 128>}, {pipeline_mode = #tpu.pipeline_mode<synchronous>, transform_indices = @transform_3, window_bounds = array<i64: 128, 128>}, {pipeline_mode = #tpu.pipeline_mode<synchronous>, transform_indices = @transform_4, window_bounds = array<i64: 1, 128>}, {transform_indices = @transform_5, window_bounds = array<i64: 16, 128>}]} {
    %c0_i32 = arith.constant 0 : i32
    %0 = arith.cmpi eq, %arg1, %c0_i32 : i32
    %1 = arith.extui %0 : i1 to i32
    %c0_i32_0 = arith.constant 0 : i32
    %2 = arith.cmpi ne, %1, %c0_i32_0 : i32
    scf.if %2 {
      %cst_9 = arith.constant 0.000000e+00 : f32
      %13 = vector.broadcast %cst_9 : f32 to vector<16x128xf32>
      %c0_10 = arith.constant 0 : index
      %c0_11 = arith.constant 0 : index
      %14 = vector.load %arg8[%c0_10, %c0_11] : memref<16x128xf32, #tpu.memory_space<vmem>>, vector<16x128xf32>
      tpu.vector_store %arg8[%c0_10, %c0_11], %13 {strides = array<i32>} : memref<16x128xf32, #tpu.memory_space<vmem>>, vector<16x128xf32>,
    } else {
    }
    %c0 = arith.constant 0 : index
    %c0_1 = arith.constant 0 : index
    %3 = vector.load %arg8[%c0, %c0_1] : memref<16x128xf32, #tpu.memory_space<vmem>>, vector<16x128xf32>
    %c0_2 = arith.constant 0 : index
    %c0_3 = arith.constant 0 : index
    %4 = vector.load %arg2[%c0_2, %c0_3] : memref<16x512xf32, #tpu.memory_space<vmem>>, vector<16x512xf32>
    %5 = arith.truncf %4 : vector<16x512xf32> to vector<16x512xbf16>
    %c0_4 = arith.constant 0 : index
    %c0_5 = arith.constant 0 : index
    %6 = vector.load %arg3[%c0_4, %c0_5] : memref<512x128xbf16, #tpu.memory_space<vmem>>, vector<512x128xbf16>
    %cst = arith.constant dense<0.000000e+00> : vector<16x128xf32>
    %7 = tpu.matmul %5, %6, %cst {dimension_numbers = #tpu.dot_dimension_numbers<[1], [0], [0], [1], [0, 0, 1, 1], [], []>} : vector<16x512xbf16>, vector<512x128xbf16>, vector<16x128xf32> -> vector<16x128xf32>
    %8 = arith.addf %3, %7 : vector<16x128xf32>
    %c0_6 = arith.constant 0 : index
    %c0_7 = arith.constant 0 : index
    %9 = vector.load %arg8[%c0_6, %c0_7] : memref<16x128xf32, #tpu.memory_space<vmem>>, vector<16x128xf32>
    tpu.vector_store %arg8[%c0_6, %c0_7], %8 {strides = array<i32>} : memref<16x128xf32, #tpu.memory_space<vmem>>, vector<16x128xf32>,
    %c1_i32 = arith.constant 1 : i32
    %10 = arith.cmpi eq, %arg1, %c1_i32 : i32
    %11 = arith.extui %10 : i1 to i32
    %c0_i32_8 = arith.constant 0 : i32
    %12 = arith.cmpi ne, %11, %c0_i32_8 : i32
    scf.if %12 {
      %c0_9 = arith.constant 0 : index
      %c0_10 = arith.constant 0 : index
      %13 = vector.load %arg8[%c0_9, %c0_10] : memref<16x128xf32, #tpu.memory_space<vmem>>, vector<16x128xf32>
      %c0_11 = arith.constant 0 : index
      %c0_12 = arith.constant 0 : index
      %14 = vector.load %arg4[%c0_11, %c0_12] : memref<1x128xf32, #tpu.memory_space<vmem>>, vector<1x128xf32>
      %15 = vector.broadcast %14 : vector<1x128xf32> to vector<16x128xf32>
      %16 = arith.addf %13, %15 : vector<16x128xf32>
      %cst_13 = arith.constant 0.000000e+00 : f32
      %17 = vector.broadcast %cst_13 : f32 to vector<16x128xf32>
      %18 = arith.maximumf %16, %17 : vector<16x128xf32>
      %19 = arith.truncf %18 : vector<16x128xf32> to vector<16x128xbf16>
      %c0_14 = arith.constant 0 : index
      %c0_15 = arith.constant 0 : index
      %20 = vector.load %arg5[%c0_14, %c0_15] : memref<128x128xbf16, #tpu.memory_space<vmem>>, vector<128x128xbf16>
      %cst_16 = arith.constant dense<0.000000e+00> : vector<16x128xf32>
      %21 = tpu.matmul %19, %20, %cst_16 {dimension_numbers = #tpu.dot_dimension_numbers<[1], [0], [0], [1], [0, 0, 1, 1], [], []>} : vector<16x128xbf16>, vector<128x128xbf16>, vector<16x128xf32> -> vector<16x128xf32>
      %c0_17 = arith.constant 0 : index
      %c0_18 = arith.constant 0 : index
      %22 = vector.load %arg6[%c0_17, %c0_18] : memref<1x128xf32, #tpu.memory_space<vmem>>, vector<1x128xf32>
      %23 = vector.broadcast %22 : vector<1x128xf32> to vector<16x128xf32>
      %24 = arith.addf %21, %23 : vector<16x128xf32>
      %c0_19 = arith.constant 0 : index
      %c0_20 = arith.constant 0 : index
      %25 = vector.load %arg7[%c0_19, %c0_20] : memref<16x128xf32, #tpu.memory_space<vmem>>, vector<16x128xf32>
      tpu.vector_store %arg7[%c0_19, %c0_20], %24 {strides = array<i32>} : memref<16x128xf32, #tpu.memory_space<vmem>>, vector<16x128xf32>,
    } else {
    }
    return
  }
  func.func @transform_0(%arg0: i32, %arg1: i32) -> (i32, i32) {
    %c0_i32 = arith.constant 0 : i32
    return %arg0, %arg1 : i32, i32
  }
  func.func @transform_1(%arg0: i32, %arg1: i32) -> (i32, i32) {
    %c0_i32 = arith.constant 0 : i32
    %c0_i32_0 = arith.constant 0 : i32
    return %arg1, %c0_i32 : i32, i32
  }
  func.func @transform_2(%arg0: i32, %arg1: i32) -> (i32, i32) {
    %c0_i32 = arith.constant 0 : i32
    %c0_i32_0 = arith.constant 0 : i32
    %c0_i32_1 = arith.constant 0 : i32
    return %c0_i32, %c0_i32_0 : i32, i32
  }
  func.func @transform_3(%arg0: i32, %arg1: i32) -> (i32, i32) {
    %c0_i32 = arith.constant 0 : i32
    %c0_i32_0 = arith.constant 0 : i32
    %c0_i32_1 = arith.constant 0 : i32
    return %c0_i32, %c0_i32_0 : i32, i32
  }
  func.func @transform_4(%arg0: i32, %arg1: i32) -> (i32, i32) {
    %c0_i32 = arith.constant 0 : i32
    %c0_i32_0 = arith.constant 0 : i32
    %c0_i32_1 = arith.constant 0 : i32
    return %c0_i32, %c0_i32_0 : i32, i32
  }
  func.func @transform_5(%arg0: i32, %arg1: i32) -> (i32, i32) {
    %c0_i32 = arith.constant 0 : i32
    %c0_i32_0 = arith.constant 0 : i32
    return %arg0, %c0_i32 : i32, i32
  }
}

</mosaic_0001>

<bundles_post_ra>
// kernel: tpu_custom_call.1
= control target key start
LH: loop header
LB: loop body
LE: loop exit
PB: predicated region body
PF: predicated region fallthrough
CT: control target
= control target key end

     0   :  { %s1882_s0 = inlined_call_operand.hbm [shape: f32[32,1024], index: 0, kind: input, shape index: {}]   ;;  %s1883_s1 = inlined_call_operand.hbm [shape: bf16[1024,128], index: 1, kind: input, shape index: {}]   ;;  %s1884_s2 = inlined_call_operand.vmem [shape: f32[1,128], index: 2, kind: input, shape index: {}]   ;;  %s1885_s3 = inlined_call_operand.hbm [shape: bf16[128,128], index: 3, kind: input, shape index: {}]   ;;  %s1886_s4 = inlined_call_operand.vmem [shape: f32[1,128], index: 4, kind: input, shape index: {}]   ;;  %s1887_s5 = inlined_call_operand.hbm [shape: f32[32,128], index: 5, kind: output, shape index: {}]  }
   0x1   :  { %1899 = sst [smem:[#allocation25_spill]] %s1882_s0 }
   0x2   :  { %1900 = sst [smem:[#allocation26_spill]] %s1884_s2 }
   0x3   :  { %1901 = sst [smem:[#allocation27_spill]] %s1885_s3 }
   0x4   :  { %1902 = sst [smem:[#allocation28_spill]] %s1886_s4 }
   0x5   :  { %1903 = sst [smem:[#allocation29_spill]] %s1887_s5 }
   0x6   :  { %10 = vsyncpa [#allocation4], 0 }
   0x7   :  { %12 = vsyncpa [#allocation4 + $0x1], 0 }
   0x8   :  { %13 = vsyncpa [#allocation7], 0 }
   0x9   :  { %15 = vsyncpa [#allocation7 + $0x1], 0 }
   0xa   :  { %16 = vsyncpa [#allocation5], 0 }
   0xb   :  { %18 = vsyncpa [#allocation5 + $0x1], 0  ;;  %s1559_s18 = smov 0   ;;  %s1561_s19 = smov 0  }
   0xc   :  { %s1563_s20 = smov 0   ;;  %s1565_s21 = smov 0  }
   0xd   :  { %s1567_s22 = smov 0   ;;  %s1569_s23 = smov 0  }
   0xe   :  { %s1571_s24 = smov 0   ;;  %s1573_s25 = smov 0  }
   0xf   :  { %s1575_s26 = smov 0   ;;  %s1577_s27 = smov 0  }
  0x10   :  { %s1579_s28 = smov 0   ;;  %s1581_s29 = smov 0  }
  0x11   :  { %s1583_s30 = smov 0   ;;  %s1585_s6 = smov 0  }
  0x12 LB: > { %1904 = sst [smem:[#allocation14_spill]] %s1466_s18  ;;  %s1626_s7 = sadd.s32 4294967295, %s1518_s6   ;;  %s1518_s6 = sphi %s1585_s6, %s24_s6   ;;  %s1514_s30 = sphi %s1583_s30, %s1941_s30   ;;  %s1510_s29 = sphi %s1581_s29, %s1953_s29   ;;  %s1506_s28 = sphi %s1579_s28, %s1952_s28   ;;  %s1502_s27 = sphi %s1577_s27, %s1951_s27   ;;  %s1498_s26 = sphi %s1575_s26, %s1938_s26   ;;  %s1494_s25 = sphi %s1573_s25, %s1950_s25   ;;  %s1490_s24 = sphi %s1571_s24, %s1949_s24   ;;  %s1486_s23 = sphi %s1569_s23, %s1948_s23   ;;  %s1482_s22 = sphi %s1567_s22, %s1947_s22   ;;  %s1478_s21 = sphi %s1565_s21, %s1946_s21   ;;  %s1474_s20 = sphi %s1563_s20, %s1945_s20   ;;  %s1470_s19 = sphi %s1561_s19, %s1944_s19   ;;  %s1466_s18 = sphi %s1559_s18, %s1943_s18  }
  0x13   : > { %1905 = sst [smem:[#allocation15_spill]] %s1498_s26  ;;  %s895_s8 = sadd.s32 4294967294, %s1518_s6  }
  0x14   : > { %1906 = sst [smem:[#allocation16_spill]] %s1502_s27  ;;  %p58_p0 = scmp.ne.s32.totalorder %s1494_s25, %s1490_s24 }
  0x15   : > { %1907 = sst [smem:[#allocation17_spill]] %s1506_s28  ;;  %p59_p1 = scmp.eq.s32.totalorder %s1626_s7, 0 }
  0x16   : > { %1908 = sst [smem:[#allocation18_spill]] %s1514_s30  ;;  %p84_p2 = scmp.ne.s32.totalorder %s1482_s22, %s1478_s21 }
  0x17   : > { %p170_p3 = scmp.ne.s32.totalorder %s1474_s20, %s1470_s19  ;;  %p1636_p4 = por %p59_p1, %p58_p0 }
  0x18   : > { %p171_p5 = scmp.eq.s32.totalorder %s1626_s7, 3  ;;  %p1643_p6 = por %p84_p2, %p59_p1 }
  0x19   : > { %p176_p7 = scmp.ne.s32.totalorder %s1470_s19, %s1466_s18  ;;  %p177_p9 = scmp.eq.s32.totalorder %s895_s8, 3 }
  0x1a   : > { %p1649_p8 = por %p171_p5, %p170_p3  ;;  %p896_p10 = scmp.ge.s32.totalorder %s1518_s6, 1 }
  0x1b   : > { %p184_p11 = scmp.lt.s32.totalorder %s1518_s6, 5  ;;  %p1655_p12 = por %p177_p9, %p176_p7 }
  0x1c   : > { %s1911_s11 = scalar_select %p1649_p8, 1, 0 }
  0x1d   : > { %s1913_s12 = scalar_select %p1655_p12, 1, 0 }
  0x1e   : > { %1912 = sst [smem:[#allocation19_spill]] %s1911_s11  ;;  %p1659_p13 = pnand %p896_p10, %p184_p11 }
  0x1f   : > { %1914 = sst [smem:[#allocation20_spill]] %s1913_s12  ;;  %s1520_s17 = smov [#allocation8]  }
  0x20   : > { %s1916_s3 = sld [smem:[#allocation27_spill]]  ;;  %p1132_p0 = pneg %p1659_p13 }
  0x21   : > { %s200_s21 = sshll.u32 %s1520_s17, 4  ;;  %s1888_s24 = smov 64   ;;  %s201_s21 = int_to_ptr.vmem [resolvable:$true] %s200_s21 }
  0x22   : > { %p1133_p2 = pnand %p1132_p0, %p59_p1  ;;  %s1889_s8 = smov 4  }
  0x23   : > { %s33_s14 = sadd.s32 1, %s1510_s29  ;;  %s36_s15 = sadd.s32 1, %s1514_s30 }
  0x24   : > { %p34_p3 = scmp.ge.s32.totalorder %s33_s14, 2  ;;  %p52_p5 = scmp.ne.s32.totalorder %s1498_s26, %s1494_s25 }
  0x25   : > { %p53_p7 = scmp.eq.s32.totalorder %s1518_s6, 0  ;;  %p1148_p0 = scmp.lt.s32.totalorder %s1518_s6, 4 }
  0x26   : > { %s198_s16 = sshll.u32 %s1916_s3, 4  ;;  %s45_s3 = sadd.s32 1, %s1498_s26  ;;  %s199_s16 = int_to_ptr.hbm [resolvable:$true] %s198_s16 }
  0x27   : > { %1135 = dma.hbm_to_vmem [thread:$0]  (!%p1133_p2), %s199_s16, 1024, %s201_s21, [#allocation7], %s1888_s24, %s1888_s24, %s1889_s8  }
  0x28   : > { %s1955_s14 = smov (%p34_p3, %s33_s14), 0  ;;  %s1957_s15 = smov (!%p34_p3, %s36_s15), %s1514_s30 }
  0x29   : > { %1917 = sst [smem:[#allocation21_spill]] %s1955_s14  ;;  %s1684_s17 = ssub.s32 %s1510_s29, %s1955_s14 }
  0x2a   : > { %p1688_p9 = por %p53_p7, %p52_p5  ;;  %p38_p10 = scmp.ge.s32.totalorder %s1957_s15, 2 }
  0x2b   : > { %p69_p11 = scmp.eq.s32.totalorder %s1684_s17, 0  ;;  %s160_s21 = sadd.s32 1, %s1474_s20 }
  0x2c   : > { %s1959_s15 = smov (%p38_p10, %s1957_s15), 0  ;;  %s217_s24 = sand.u32 1, %s1498_s26  }
  0x2d   : > { %1919 = sst [smem:[#allocation22_spill]] %s1959_s15  ;;  %s901_s8 = sshll.u32 %s1510_s29, 2 }
  0x2e   : > { %s40_s14 = ssub.s32 %s1514_s30, %s1959_s15  ;;  %s899_s18 = sshll.u32 %s217_s24, 6 }
  0x2f   : > { %s42_s12 = sor.u32 %s1684_s17, %s40_s14  ;;  %p158_p2 = scmp.eq.s32.totalorder %s40_s14, 0 }
  0x30   : > { %p43_p3 = scmp.eq.s32.totalorder %s42_s12, 0  ;;  %s1079_s28 = sshll.u32 %s1514_s30, 4 }
  0x31   : > { %s1703_s5 = scalar_select %p158_p2, %s1474_s20, %s160_s21  }
  0x32   : > { %s1706_s11 = scalar_select %p43_p3, %s1498_s26, %s45_s3  }
  0x33   : > { %1920 = sst [smem:[#allocation23_spill]] %s1703_s5  ;;  %s227_s4 = sadd.s32 %s1079_s28, %s901_s8 }
  0x34   : > { %1921 = sst [smem:[#allocation24_spill]] %s1706_s11  ;;  %s221_s2 = scalar_lea.vmem [#allocation3], %s899_s18 }
  0x35   : > { %s232_s27 = sshll.u32 %s221_s2, 4  ;;  %s903_s15 = sshll.u32 %s227_s4, 3  ;;  %s233_s27 = int_to_ptr.vmem [resolvable:$true] %s232_s27 }
  0x36   : > { %s1922_s0 = sld [smem:[#allocation25_spill]]  ;;  %p1137_p5 = pnand %p1148_p0, %p1688_p9 }
  0x37   : > { %s218_s28 = scalar_lea.sflag [#allocation4], %s217_s24  ;;  %s1523_s8 = smov 1024  }
  0x38   : > { %s1524_s18 = smov 512   ;;  %s1525_s30 = smov 32  }
  0x39   : > { %s242_s2 = sand.u32 1, %s1518_s6   ;;  %s71_s4 = sadd.s32 1, %s1486_s23 }
  0x3a   : > { %p78_p10 = scmp.ne.s32.totalorder %s1486_s23, %s1482_s22  ;;  %s1080_s12 = sshll.u32 %s1510_s29, 8 }
  0x3b   : > { %s1723_s11 = scalar_select %p69_p11, %s1486_s23, %s71_s4  }
  0x3c   : > { %s229_s21 = scalar_lea.hbm %s1922_s0, %s903_s15  ;;  %p80_p2 = por %p78_p10, %p53_p7 }
  0x3d   : > { %s230_s3 = sshll.u32 %s229_s21, 4  ;;  %s244_s15 = sand.u32 1, %s1486_s23   ;;  %s231_s3 = int_to_ptr.hbm [resolvable:$true] %s230_s3 }
  0x3e   : > { %1139 = dma.hbm_to_vmem [thread:$0]  (!%p1137_p5), %s231_s3, 1024, %s233_s27, %s218_s28, %s1523_s8, %s1524_s18, %s1525_s30  }
  0x3f   : > { %s904_s16 = sshll.u32 %s244_s15, 8  ;;  %s251_s24 = scalar_lea.hbm %s1883_s1, %s1080_s12 }
  0x40   : > { %s252_s0 = sshll.u32 %s251_s24, 4  ;;  %s246_s26 = scalar_lea.vmem [#allocation6], %s904_s16  ;;  %s253_s0 = int_to_ptr.hbm [resolvable:$true] %s252_s0 }
  0x41   : > { %s254_s5 = sshll.u32 %s246_s26, 4  ;;  %p1140_p9 = pnand %p1148_p0, %p80_p2  ;;  %s255_s5 = int_to_ptr.vmem [resolvable:$true] %s254_s5 }
  0x42   : > { %s243_s27 = scalar_lea.sflag [#allocation7], %s242_s2  ;;  %s1923_s30 = smov 4  }
  0x43   : > { %s1924_s17 = smov 64   ;;  %266 = sbr.rel (%p1659_p13) target bundleno = 467 (0x1d3), region = 40 }
  0x44   : > { %1142 = dma.hbm_to_vmem [thread:$0]  (!%p1140_p9), %s253_s0, 4096, %s255_s5, %s243_s27, %s1924_s17, %s1924_s17, %s1923_s30  }
  0x45   : > { %s268_s3 = sand.u32 (!%p1659_p13), 1, %s1494_s25  }
  0x46   : > { %s908_s28 = sshll.u32 (!%p1659_p13), %s268_s3, 6  ;;  %s269_s8 = scalar_lea.sflag (!%p1659_p13), [#allocation4], %s268_s3 }
  0x47   : > { %s1740_s18 = scalar_lea.vmem (!%p1659_p13), [#allocation3], %s908_s28 }
  0x48   : > { %1449 = dma.done.wait (%p1636_p4), %s269_s8, 1024  }
  0x49   : > { %1451 = vsyncadd (%p1636_p4), %s269_s8, 4294966272  ;;  %s278_s26 = sand.u32 1, %s1626_s7   ;;  %s280_s0 = sand.u32 1, %s1482_s22  }
  0x4a   : > { %s909_s5 = sshll.u32 %s280_s0, 8  ;;  %s279_s13 = scalar_lea.sflag [#allocation7], %s278_s26 }
  0x4b   : > { %s1748_s2 = scalar_lea.vmem [#allocation6], %s909_s5 }
  0x4c   : > { %1453 = dma.done.wait (%p1643_p6), %s279_s13, 4096  }
  0x4d   : > { %1455 = vsyncadd (%p1643_p6), %s279_s13, 4294963200 }
  0x4e   : > { %1457 = dma.done.wait (%p59_p1), [#allocation7], 1024  }
  0x4f   : > { %1459 = vsyncadd (%p59_p1), [#allocation7], 4294966272  ;;  %s317_s9 = sand.u32 1, %s1470_s19   ;;  %s1925_s16 = sld [smem:[#allocation16_spill]] }
  0x50   : > { %s911_s4 = sshll.u32 %s317_s9, 4 }
  0x51   : > { %s1761_s15 = scalar_lea.vmem [#allocation9], %s911_s4 }
  0x55   : > { %p912_p4 = scmp.ne.s32.totalorder %s1925_s16, 0 }
  0x57   : > { %327 = sbr.rel (%p912_p4) target bundleno = 95 (0x5f), region = 56 }
  0x5c   : > { %v1526_v0 = vmov 0.0  }
  0x5d   : > { %328 = vst [vmem:[#allocation2] sm:$0xff] %v1526_v0 }
  0x5e   : > { %329 = vst [vmem:[#allocation2 + $0x8] sm:$0xff] %v1526_v0 }
  0x5f PF: > { %v1088_v1 = vld [vmem:[%s1748_s2 + $0x38] sm:$0xff]  ;;  %v1087_v5 = vld [vmem:[%s1748_s2 + $0x30] sm:$0xff]  ;;  %v1086_v9 = vld [vmem:[%s1748_s2 + $0x28] sm:$0xff]  ;;  %s1926_s7 = sld [smem:[#allocation16_spill]] }
  0x60   : > { %v1096_v2 = vld [vmem:[%s1748_s2 + $0x78] sm:$0xff]  ;;  %600 = vmatpush.bf16.msra.mxu0 %v1088_v1  ;;  %v1095_v6 = vld [vmem:[%s1748_s2 + $0x70] sm:$0xff]  ;;  %v1094_v10 = vld [vmem:[%s1748_s2 + $0x68] sm:$0xff] }
  0x61   : > { %v1104_v3 = vld [vmem:[%s1748_s2 + $0xb8] sm:$0xff]  ;;  %614 = vmatpush.bf16.msra.mxu1 %v1096_v2  ;;  %v1103_v7 = vld [vmem:[%s1748_s2 + $0xb0] sm:$0xff]  ;;  %v1102_v11 = vld [vmem:[%s1748_s2 + $0xa8] sm:$0xff] }
  0x62   : > { %v1112_v4 = vld [vmem:[%s1748_s2 + $0xf8] sm:$0xff]  ;;  %628 = vmatpush.bf16.msra.mxu2 %v1104_v3  ;;  %v1111_v8 = vld [vmem:[%s1748_s2 + $0xf0] sm:$0xff]  ;;  %v1110_v12 = vld [vmem:[%s1748_s2 + $0xe8] sm:$0xff] }
  0x63   : > { %642 = vmatpush.bf16.msra.mxu3 %v1112_v4  ;;  %v1085_v13 = vld [vmem:[%s1748_s2 + $0x20] sm:$0xff]  ;;  %v1084_v17 = vld [vmem:[%s1748_s2 + $0x18] sm:$0xff]  ;;  %v1083_v21 = vld [vmem:[%s1748_s2 + $0x10] sm:$0xff] }
  0x64   : > { %601 = vmatpush.bf16.msra.mxu0 %v1087_v5  ;;  %v1093_v14 = vld [vmem:[%s1748_s2 + $0x60] sm:$0xff]  ;;  %v1092_v18 = vld [vmem:[%s1748_s2 + $0x58] sm:$0xff]  ;;  %v1091_v22 = vld [vmem:[%s1748_s2 + $0x50] sm:$0xff] }
  0x65   : > { %615 = vmatpush.bf16.msra.mxu1 %v1095_v6  ;;  %v1101_v15 = vld [vmem:[%s1748_s2 + $0xa0] sm:$0xff]  ;;  %v1100_v19 = vld [vmem:[%s1748_s2 + $0x98] sm:$0xff]  ;;  %v1099_v23 = vld [vmem:[%s1748_s2 + $0x90] sm:$0xff]  ;;  %p1041_p1 = scmp.ne.s32.totalorder %s1926_s7, 1 }
  0x66   : > { %629 = vmatpush.bf16.msra.mxu2 %v1103_v7  ;;  %v1109_v16 = vld [vmem:[%s1748_s2 + $0xe0] sm:$0xff]  ;;  %v1108_v20 = vld [vmem:[%s1748_s2 + $0xd8] sm:$0xff]  ;;  %v1107_v24 = vld [vmem:[%s1748_s2 + $0xd0] sm:$0xff]  ;;  %s1927_s14 = sld [smem:[#allocation26_spill]] (!%p1041_p1) }
  0x67   : > { %643 = vmatpush.bf16.msra.mxu3 %v1111_v8  ;;  %v1082_v25 = vld [vmem:[%s1748_s2 + $0x8] sm:$0xff]  ;;  %v1081_v29 = vld [vmem:[%s1748_s2] sm:$0xff]  ;;  %v334_v37 = vld [vmem:[%s1740_s18 + $0x10] sm:$0xff]  ;;  %s1928_s27 = sld [smem:[#allocation28_spill]] (!%p1041_p1) }
  0x68   : > { %602 = vmatpush.bf16.msra.mxu0 %v1086_v9  ;;  %v1090_v26 = vld [vmem:[%s1748_s2 + $0x48] sm:$0xff]  ;;  %v1089_v30 = vld [vmem:[%s1748_s2 + $0x40] sm:$0xff]  ;;  %v338_v38 = vld [vmem:[%s1740_s18 + $0x30] sm:$0xff] }
  0x69   : > { %616 = vmatpush.bf16.msra.mxu1 %v1094_v10  ;;  %v1098_v27 = vld [vmem:[%s1748_s2 + $0x88] sm:$0xff]  ;;  %v1097_v31 = vld [vmem:[%s1748_s2 + $0x80] sm:$0xff]  ;;  %v335_v39 = vld [vmem:[%s1740_s18 + $0x18] sm:$0xff]  ;;  %v342_v43 = vpack.c.bf16 %v338_v38, %v334_v37 }
  0x6a   : > { %630 = vmatpush.bf16.msra.mxu2 %v1102_v11  ;;  %v1106_v28 = vld [vmem:[%s1748_s2 + $0xc8] sm:$0xff]  ;;  %v1105_v32 = vld [vmem:[%s1748_s2 + $0xc0] sm:$0xff]  ;;  %v339_v40 = vld [vmem:[%s1740_s18 + $0x38] sm:$0xff] }
  0x6b   : > { %644 = vmatpush.bf16.msra.mxu3 %v1110_v12  ;;  %v332_v33 = vld [vmem:[%s1740_s18] sm:$0xff]  ;;  %v333_v35 = vld [vmem:[%s1740_s18 + $0x8] sm:$0xff]  ;;  %v343_v44 = vpack.c.bf16 %v339_v40, %v335_v39  ;;  %v330_v51 = vld [vmem:[#allocation2] sm:$0xff] }
  0x6c   : > { %603 = vmatpush.bf16.msra.mxu0 %v1085_v13  ;;  %v336_v34 = vld [vmem:[%s1740_s18 + $0x20] sm:$0xff]  ;;  %v337_v36 = vld [vmem:[%s1740_s18 + $0x28] sm:$0xff]  ;;  %v331_v59 = vld [vmem:[#allocation2 + $0x8] sm:$0xff] }
  0x6d   : > { %617 = vmatpush.bf16.msra.mxu1 %v1093_v14  ;;  %v340_v41 = vpack.c.bf16 %v336_v34, %v332_v33  ;;  %v341_v42 = vpack.c.bf16 %v337_v36, %v333_v35 }
  0x6e   : > { %631 = vmatpush.bf16.msra.mxu2 %v1101_v15 }
  0x6f   : > { %645 = vmatpush.bf16.msra.mxu3 %v1109_v16 }
  0x70   : > { %604 = vmatpush.bf16.msra.mxu0 %v1084_v17 }
  0x71   : > { %618 = vmatpush.bf16.msra.mxu1 %v1092_v18 }
  0x72   : > { %632 = vmatpush.bf16.msra.mxu2 %v1100_v19 }
  0x73   : > { %646 = vmatpush.bf16.msra.mxu3 %v1108_v20 }
  0x74   : > { %605 = vmatpush.bf16.msra.mxu0 %v1083_v21 }
  0x75   : > { %619 = vmatpush.bf16.msra.mxu1 %v1091_v22 }
  0x76   : > { %633 = vmatpush.bf16.msra.mxu2 %v1099_v23 }
  0x77   : > { %647 = vmatpush.bf16.msra.mxu3 %v1107_v24 }
  0x78   : > { %606 = vmatpush.bf16.msra.mxu0 %v1082_v25 }
  0x79   : > { %620 = vmatpush.bf16.msra.mxu1 %v1090_v26 }
  0x7a   : > { %634 = vmatpush.bf16.msra.mxu2 %v1098_v27 }
  0x7b   : > { %648 = vmatpush.bf16.msra.mxu3 %v1106_v28 }
  0x7c   : > { %607 = vmatpush.bf16.msra.mxu0 %v1081_v29 }
  0x7d   : > { %621 = vmatpush.bf16.msra.mxu1 %v1089_v30 }
  0x7e   : > { %635 = vmatpush.bf16.msra.mxu2 %v1097_v31 }
  0x7f   : > { %649 = vmatpush.bf16.msra.mxu3 %v1105_v32  ;;  %608 = vmatmul.bf16.vlgmr.msra.gmra.mxu0 %v340_v41 }
  0x80   : > { %622 = vmatmul.bf16.vlgmr.msra.gmra.mxu1 %v341_v42 }
  0x81   : > { %636 = vmatmul.bf16.vlgmr.msra.gmra.mxu2 %v342_v43 }
  0x82   : > { %650 = vmatmul.bf16.vlgmr.msra.gmra.mxu3 %v343_v44 }
  0xfc   : > { %v609_v45 = vpop.f32.mrf.mxu0 }
  0xfd   : > { %v623_v46 = vpop.f32.mrf.mxu1 }
  0xfe   : > { %v624_v47 = vadd.f32 %v623_v46, %v609_v45 }
 0x104   : > { %v637_v48 = vpop.f32.mrf.mxu2  ;;  %v611_v53 = vpop.f32.mrf.mxu0 }
 0x105   : > { %v651_v49 = vpop.f32.mrf.mxu3  ;;  %v638_v50 = vadd.f32 %v637_v48, %v624_v47  ;;  %v625_v54 = vpop.f32.mrf.mxu1 }
 0x106   : > { %v626_v56 = vadd.f32 %v625_v54, %v611_v53 }
 0x107   : > { %v652_v52 = vadd.f32 %v651_v49, %v638_v50 }
 0x109   : > { %v656_v55 = vadd.f32 %v652_v52, %v330_v51 }
 0x10b   : > { %658 = vst [vmem:[#allocation2] sm:$0xff] %v656_v55 }
 0x10c   : > { %v639_v57 = vpop.f32.mrf.mxu2 }
 0x10d   : > { %v640_v58 = vadd.f32 %v639_v57, %v626_v56  ;;  %v653_v60 = vpop.f32.mrf.mxu3 }
 0x10f   : > { %v654_v61 = vadd.f32 %v653_v60, %v640_v58  ;;  %663 = sbr.rel (%p1041_p1) target bundleno = 445 (0x1bd), region = 60 }
 0x111   : > { %v657_v62 = vadd.f32 %v654_v61, %v331_v59 }
 0x113   : > { %659 = vst [vmem:[#allocation2 + $0x8] sm:$0xff] %v657_v62 }
 0x114   : > { %v1120_v63 = vld [vmem:[#allocation8 + $0x38] sm:$0xff]  ;;  %v1119_v0 = vld [vmem:[#allocation8 + $0x30] sm:$0xff]  ;;  %v1118_v1 = vld [vmem:[#allocation8 + $0x28] sm:$0xff] }
 0x115   : > { %743 = vmatpush.bf16.msra.mxu0 %v1120_v63  ;;  %v1117_v2 = vld [vmem:[#allocation8 + $0x20] sm:$0xff]  ;;  %v1116_v3 = vld [vmem:[#allocation8 + $0x18] sm:$0xff]  ;;  %v1272_v4 = vld [vmem:[%s1927_s14] ss:$0 sm:$0xff] }
 0x116   : > { %v1115_v5 = vld [vmem:[#allocation8 + $0x10] sm:$0xff]  ;;  %v1114_v10 = vld [vmem:[#allocation8 + $0x8] sm:$0xff]  ;;  %v1113_v13 = vld [vmem:[#allocation8] sm:$0xff] }
 0x117   : > { %v664_v6 = vld [vmem:[#allocation2] sm:$0xff] }
 0x118   : > { %v670_v8 = vadd.f32 %v1272_v4, %v664_v6  ;;  %v1273_v15 = vld [vmem:[%s1928_s27] ss:$0 sm:$0xff] }
 0x119   : > { %744 = vmatpush.bf16.msra.mxu0 %v1119_v0 }
 0x11a   : > { %v665_v7 = vld [vmem:[#allocation2 + $0x8] sm:$0xff]  ;;  %v672_v11 = vmax.f32 %v670_v8, 0.0 }
 0x11b   : > { %v671_v9 = vadd.f32 %v1272_v4, %v665_v7 }
 0x11d   : > { %745 = vmatpush.bf16.msra.mxu0 %v1118_v1  ;;  %v673_v12 = vmax.f32 %v671_v9, 0.0 }
 0x11f   : > { %v674_v14 = vpack.c.bf16 %v673_v12, %v672_v11 }
 0x121   : > { %746 = vmatpush.bf16.msra.mxu0 %v1117_v2 }
 0x125   : > { %747 = vmatpush.bf16.msra.mxu0 %v1116_v3 }
 0x129   : > { %748 = vmatpush.bf16.msra.mxu0 %v1115_v5 }
 0x12d   : > { %749 = vmatpush.bf16.msra.mxu0 %v1114_v10 }
 0x131   : > { %750 = vmatpush.bf16.msra.mxu0 %v1113_v13 }
 0x134   : > { %751 = vmatmul.bf16.vlgmr.msra.gmra.mxu0 %v674_v14 }
 0x1b1   : > { %v752_v16 = vpop.f32.mrf.mxu0 }
 0x1b2   : > { %v753_v17 = vadd.f32 %v1273_v15, %v752_v16 }
 0x1b4   : > { %757 = vst [vmem:[%s1761_s15] sm:$0xff] %v753_v17 }
 0x1b9   : > { %v754_v18 = vpop.f32.mrf.mxu0 }
 0x1ba   : > { %v755_v19 = vadd.f32 %v1273_v15, %v754_v18 }
 0x1bc   : > { %758 = vst [vmem:[%s1761_s15 + $0x8] sm:$0xff] %v755_v19 }
 0x1bd PF: > { %s1929_s30 = sld [smem:[#allocation17_spill]]  ;;  %s772_s5 = sshll.u32 %s1761_s15, 4  ;;  %s773_s5 = int_to_ptr.vmem [resolvable:$true] %s772_s5 }
 0x1be   : > { %s1931_s18 = sld [smem:[#allocation29_spill]]  ;;  %s760_s2 = scalar_lea.sflag [#allocation5], %s317_s9 }
 0x1c3   : > { %s1121_s3 = sshll.u32 %s1929_s30, 4 }
 0x1c4   : > { %s1932_s0 = smov %s1931_s18  ;;  %s771_s26 = scalar_lea.hbm %s1931_s18, %s1121_s3 }
 0x1c5   : > { %s774_s13 = sshll.u32 %s771_s26, 4  ;;  %s1384_s12 = scalar_lea.hbm %s1932_s0, 32  ;;  %s775_s13 = int_to_ptr.hbm [resolvable:$true] %s774_s13 }
 0x1c6   : > { %s1378_s4 = sshra.s32 %s775_s13, 4  ;;  %s1379_s4 = int_to_ptr.hbm [resolvable:$true] %s1378_s4 }
 0x1c7   : > { %s1380_s16 = scalar_lea.hbm %s1379_s4, 16  ;;  %p1385_p11 = scmp.lt.s32.totalorder %s1379_s4, %s1932_s0 }
 0x1c8   : > { %p1381_p6 = scmp.ne.s32.totalorder %s1379_s4, %s1380_s16  ;;  %p1386_p0 = scmp.lt.s32.totalorder %s1384_s12, %s1380_s16 }
 0x1ca   : > { %p1382_p13 = pnand %p1381_p6, %p1649_p8  ;;  %p1387_p3 = por %p1386_p0, %p1385_p11 }
 0x1cc   : > { %p1383_p7 = pneg %p1382_p13 }
 0x1ce   : > { %p1388_p5 = pnand %p1387_p3, %p1383_p7 }
 0x1d0   : > { %1391 = shalt.err (!%p1388_p5)
}
 0x1d1   : > { %s1527_s9 = smov 128   ;;  %s1528_s15 = smov 8  }
 0x1d2   : > { %1130 = dma.vmem_to_hbm [thread:$0]  (%p1649_p8), %s773_s5, 256, %s775_s13, %s760_s2, %s1527_s9, %s1527_s9, %s1528_s15  }
 0x1d3 PF: > { %s1933_s24 = sld [smem:[#allocation14_spill]]  ;;  %p1150_p10 = scmp.ge.s32.totalorder %s1518_s6, 2 }
 0x1d5   : > { %p1144_p2 = pnand %p1150_p10, %p1655_p12 }
 0x1d7   : > { %p1145_p9 = pneg %p1144_p2 }
 0x1d9   : > { %s789_s30 = sand.u32 1, %s1933_s24  }
 0x1da   : > { %s790_s3 = scalar_lea.sflag [#allocation5], %s789_s30 }
 0x1db   : > { %1461 = dma.done.wait (%p1145_p9), %s790_s3, 256  }
 0x1dc   : > { %1463 = vsyncadd (%p1145_p9), %s790_s3, 4294967040  ;;  %s24_s6 = sadd.s32 1, %s1518_s6   ;;  %s1936_s17 = sld [smem:[#allocation23_spill]] }
 0x1dd   : > { %p1835_p4 = scmp.ge.s32.totalorder %s24_s6, 6   ;;  %s1937_s8 = sld [smem:[#allocation15_spill]] }
 0x1de   : > { %s1938_s26 = sld [smem:[#allocation24_spill]]  ;;  %s1943_s18 = smov %s1470_s19 }
 0x1df   : > { %s1939_s5 = sld [smem:[#allocation18_spill]]  ;;  %s1944_s19 = smov %s1474_s20 }
 0x1e0   : > { %s1940_s13 = sld [smem:[#allocation21_spill]]  ;;  %s1946_s21 = smov %s1482_s22 }
 0x1e1   : > { %s1941_s30 = sld [smem:[#allocation22_spill]]  ;;  %s1947_s22 = smov %s1486_s23 }
 0x1e2   : > { %s1945_s20 = smov %s1936_s17  ;;  %s1948_s23 = smov %s1723_s11 }
 0x1e3   : > { %s1949_s24 = smov %s1494_s25  ;;  %s1950_s25 = smov %s1937_s8 }
 0x1e4   : > { %s1951_s27 = smov %s1510_s29  ;;  %23 = sbr.rel (!%p1835_p4) target bundleno = 18 (0x12), region = 110 }
 0x1e5   : > { %s1952_s28 = smov %s1939_s5 }
 0x1e6   : > { %s1953_s29 = smov %s1940_s13 }
 0x1e9   :  { %796 = vsyncpa [#allocation4], 1 }
 0x1ea   :  { %798 = vsyncpa [#allocation4 + $0x1], 1 }
 0x1eb   :  { %799 = vsyncpa [#allocation7], 1 }
 0x1ec   :  { %801 = vsyncpa [#allocation7 + $0x1], 1 }
 0x1ed   :  { %802 = vsyncpa [#allocation5], 1 }
 0x1ee   :  { %804 = vsyncpa [#allocation5 + $0x1], 1 }

</bundles_post_ra>
